<compile_context>
chip_gen: v7x
topology: tpu7x:2x2x1
jax: 0.10.0
libtpu: 0.0.40
codegen_flags: <defaults>
</compile_context>

<pallas_src>
import math
from functools import lru_cache, partial

import jax
import jax.numpy as jnp
from jax import lax
from jax.experimental import pallas as pl
from jax.experimental.pallas import tpu as pltpu


def _atloc_plus_kernel(pred_ref, targ_ref, out_ref, *, T, D,
                       w_abs_t, w_abs_q, w_vo_t, w_vo_q, const_term):
    # pred_ref / targ_ref: VMEM (B, T*D) in native dtype (lane index = t*D + d)
    # out_ref: SMEM (1, 1) f32 scalar loss
    pred = pred_ref[...].astype(jnp.float32)
    targ = targ_ref[...].astype(jnp.float32)
    N = T * D

    # Error computed once; both the absolute and the VO losses derive from it.
    e = pred - targ
    diff = jnp.abs(e)

    # --- absolute-pose L1 losses, scale folded into a per-lane weight row ---
    # translation lanes are those with (lane % D) < 3
    col = lax.broadcasted_iota(jnp.int32, (1, N), 1)
    w_abs = jnp.where((col % D) < 3,
                      jnp.float32(w_abs_t), jnp.float32(w_abs_q))
    abs_term = jnp.sum(diff * w_abs)

    # --- visual-odometry L1 losses: (pred_vos - targ_vos) == e[t+1] - e[t] ---
    # In the (B, T*D) layout that is e[:, D:] - e[:, :N-D] (static lane slices).
    vdiff = jnp.abs(e[:, D:] - e[:, : N - D])          # (B, (T-1)*D)
    vcol = lax.broadcasted_iota(jnp.int32, (1, N - D), 1)
    w_vo = jnp.where((vcol % D) < 3,
                     jnp.float32(w_vo_t), jnp.float32(w_vo_q))
    vo_term = jnp.sum(vdiff * w_vo)

    out_ref[0, 0] = abs_term + vo_term + jnp.float32(const_term)


@lru_cache(maxsize=None)
def _build_atloc_plus(B, T, D, dtype_name, sax, saq, srx, srq):
    n_t, n_q = 3, D - 3
    # Static weights: exp(-s) / element-count (L1Loss 'mean' reduction).
    w_abs_t = math.exp(-sax) / (B * T * n_t)
    w_abs_q = math.exp(-saq) / (B * T * n_q)
    w_vo_t = math.exp(-srx) / (B * (T - 1) * n_t)
    w_vo_q = math.exp(-srq) / (B * (T - 1) * n_q)
    const_term = float(sax + saq + srx + srq)

    itemsize = jnp.dtype(dtype_name).itemsize
    cost = pl.CostEstimate(
        flops=8 * B * T * D,
        transcendentals=0,
        bytes_accessed=2 * B * T * D * itemsize + 4,
    )

    kernel = partial(_atloc_plus_kernel, T=T, D=D,
                     w_abs_t=w_abs_t, w_abs_q=w_abs_q,
                     w_vo_t=w_vo_t, w_vo_q=w_vo_q, const_term=const_term)

    # No grid: the whole problem (~a few vregs) fits trivially in VMEM on any
    # generation; a grid (even across v7x's 2 TensorCores) would only add
    # per-step overhead for a latency-bound kernel this small.
    call = pl.pallas_call(
        kernel,
        out_shape=jax.ShapeDtypeStruct((1, 1), jnp.float32),
        in_specs=[
            pl.BlockSpec(memory_space=pltpu.MemorySpace.VMEM),  # pred (full)
            pl.BlockSpec(memory_space=pltpu.MemorySpace.VMEM),  # targ (full)
        ],
        out_specs=pl.BlockSpec(memory_space=pltpu.MemorySpace.SMEM),
        cost_estimate=cost,
    )

    @jax.jit
    def run(pred, targ):
        # Free reshape of trailing contiguous dims (bitcast): fused into the
        # same compiled program as the pallas_call -> single dispatch.
        p2 = pred.reshape(B, T * D)
        t2 = targ.reshape(B, T * D)
        return call(p2, t2)[0, 0]

    return run


def atloc_plus_criterion(pred, targ, sax=0.0, saq=0.0, srx=0.0, srq=0.0):
    """Pallas implementation of AtLocPlusCriterion.forward (L1 / L1 losses).

    sax/saq/srx/srq are static Python floats (matching the PyTorch module's
    non-learnable-parameter usage) and are baked into the kernel.
    """
    assert pred.shape == targ.shape and pred.ndim == 3 and pred.shape[1] >= 2
    B, T, D = pred.shape
    assert D == 6, "AtLocPlusCriterion expects 6-DoF poses"
    run = _build_atloc_plus(B, T, D, jnp.dtype(pred.dtype).name,
                            float(sax), float(saq), float(srx), float(srq))
    return run(pred, targ)


def _reference(pred, targ, sax=0.0, saq=0.0, srx=0.0, srq=0.0):
    """Pure-JAX reference mirroring the PyTorch module exactly."""
    p2 = pred.reshape(-1, pred.shape[-1])
    t2 = targ.reshape(-1, targ.shape[-1])
    abs_loss = (
        jnp.exp(-sax) * jnp.mean(jnp.abs(p2[:, :3] - t2[:, :3])) + sax
        + jnp.exp(-saq) * jnp.mean(jnp.abs(p2[:, 3:] - t2[:, 3:])) + saq
    )
    pv = (pred[:, 1:, :] - pred[:, :-1, :]).reshape(-1, pred.shape[-1])
    tv = (targ[:, 1:, :] - targ[:, :-1, :]).reshape(-1, targ.shape[-1])
    vo_loss = (
        jnp.exp(-srx) * jnp.mean(jnp.abs(pv[:, :3] - tv[:, :3])) + srx
        + jnp.exp(-srq) * jnp.mean(jnp.abs(pv[:, 3:] - tv[:, 3:])) + srq
    )
    return abs_loss + vo_loss


if __name__ == "__main__":
    # Deterministic parameter init (matches nn.Parameter([0.0]) defaults).
    sax, saq, srx, srq = 0.0, 0.0, 0.0, 0.0

    key = jax.random.PRNGKey(0)
    k1, k2 = jax.random.split(key)
    B, T, D = 64, 3, 6  # the documented [64, 3, 6] shapes (still tiny)
    pred = jax.random.normal(k1, (B, T, D), dtype=jnp.float32)
    targ = jax.random.normal(k2, (B, T, D), dtype=jnp.float32)

    loss = atloc_plus_criterion(pred, targ, sax, saq, srx, srq)
    loss = jax.block_until_ready(loss)

    ref = jax.block_until_ready(_reference(pred, targ, sax, saq, srx, srq))
    assert jnp.allclose(loss, ref, rtol=1e-5, atol=1e-5), (loss, ref)
    print("KERNEL_OK")
</pallas_src>

<mosaic_0001>
module attributes {stable_mosaic.version = 11 : i64} {
  func.func @_atloc_plus_kernel(%arg0: memref<64x18xf32, #tpu.memory_space<vmem>>, %arg1: memref<64x18xf32, #tpu.memory_space<vmem>>, %arg2: memref<1x1xf32, #tpu.memory_space<smem>>) attributes {dimension_semantics = [], scalar_prefetch = 0 : i64, scratch_operands = 0 : i64, tpu.core_type = #tpu.core_type<tc>} {
    %c0 = arith.constant 0 : index
    %c0_0 = arith.constant 0 : index
    %0 = vector.load %arg0[%c0, %c0_0] : memref<64x18xf32, #tpu.memory_space<vmem>>, vector<64x18xf32>
    %c0_1 = arith.constant 0 : index
    %c0_2 = arith.constant 0 : index
    %1 = vector.load %arg1[%c0_1, %c0_2] : memref<64x18xf32, #tpu.memory_space<vmem>>, vector<64x18xf32>
    %2 = arith.subf %0, %1 : vector<64x18xf32>
    %3 = math.absf %2 : vector<64x18xf32>
    %4 = tpu.iota {dimensions = array<i32: 1>} : vector<1x18xi32>
    %c6_i32 = arith.constant 6 : i32
    %c0_i32 = arith.constant 0 : i32
    %5 = arith.cmpi eq, %c6_i32, %c0_i32 : i32
    %c1_i32 = arith.constant 1 : i32
    %6 = arith.select %5, %c1_i32, %c6_i32 : i32
    %7 = vector.broadcast %6 : i32 to vector<1x18xi32>
    %8 = arith.remsi %4, %7 : vector<1x18xi32>
    %c0_i32_3 = arith.constant 0 : i32
    %9 = vector.broadcast %c0_i32_3 : i32 to vector<1x18xi32>
    %10 = arith.cmpi ne, %8, %9 : vector<1x18xi32>
    %c0_i32_4 = arith.constant 0 : i32
    %11 = vector.broadcast %c0_i32_4 : i32 to vector<1x18xi32>
    %12 = arith.cmpi slt, %8, %11 : vector<1x18xi32>
    %c0_i32_5 = arith.constant 0 : i32
    %13 = arith.cmpi slt, %6, %c0_i32_5 : i32
    %14 = vector.broadcast %13 : i1 to vector<1x18xi1>
    %15 = vector.broadcast %14 : vector<1x18xi1> to vector<1x18xi1>
    %16 = arith.xori %12, %15 : vector<1x18xi1>
    %17 = arith.andi %16, %10 : vector<1x18xi1>
    %18 = vector.broadcast %6 : i32 to vector<1x18xi32>
    %19 = arith.addi %8, %18 : vector<1x18xi32>
    %20 = arith.select %17, %19, %8 : vector<1x18xi1>, vector<1x18xi32>
    %c3_i32 = arith.constant 3 : i32
    %21 = vector.broadcast %c3_i32 : i32 to vector<1x18xi32>
    %22 = arith.cmpi slt, %20, %21 : vector<1x18xi32>
    %cst = arith.constant 0.00173611112 : f32
    %cst_6 = arith.constant 0.00173611112 : f32
    %23 = vector.broadcast %cst : f32 to vector<1x18xf32>
    %24 = vector.broadcast %cst_6 : f32 to vector<1x18xf32>
    %25 = arith.select %22, %23, %24 : vector<1x18xi1>, vector<1x18xf32>
    %26 = vector.broadcast %25 : vector<1x18xf32> to vector<64x18xf32>
    %27 = arith.mulf %3, %26 : vector<64x18xf32>
    %28 = vector.shape_cast %27 : vector<64x18xf32> to vector<1x64x18xf32>
    %cst_7 = arith.constant dense<0.000000e+00> : vector<1xf32>
    %29 = vector.multi_reduction <add>, %28, %cst_7 [1, 2] : vector<1x64x18xf32> to vector<1xf32>
    %30 = vector.shape_cast %29 : vector<1xf32> to vector<1x1x1xf32>
    %31 = vector.extract %30[0, 0, 0] : f32 from vector<1x1x1xf32>
    %32 = vector.extract_strided_slice %2 {offsets = [0, 6], sizes = [64, 12], strides = [1, 1]} : vector<64x18xf32> to vector<64x12xf32>
    %33 = vector.extract_strided_slice %2 {offsets = [0, 0], sizes = [64, 12], strides = [1, 1]} : vector<64x18xf32> to vector<64x12xf32>
    %34 = arith.subf %32, %33 : vector<64x12xf32>
    %35 = math.absf %34 : vector<64x12xf32>
    %36 = tpu.iota {dimensions = array<i32: 1>} : vector<1x12xi32>
    %c6_i32_8 = arith.constant 6 : i32
    %c0_i32_9 = arith.constant 0 : i32
    %37 = arith.cmpi eq, %c6_i32_8, %c0_i32_9 : i32
    %c1_i32_10 = arith.constant 1 : i32
    %38 = arith.select %37, %c1_i32_10, %c6_i32_8 : i32
    %39 = vector.broadcast %38 : i32 to vector<1x12xi32>
    %40 = arith.remsi %36, %39 : vector<1x12xi32>
    %c0_i32_11 = arith.constant 0 : i32
    %41 = vector.broadcast %c0_i32_11 : i32 to vector<1x12xi32>
    %42 = arith.cmpi ne, %40, %41 : vector<1x12xi32>
    %c0_i32_12 = arith.constant 0 : i32
    %43 = vector.broadcast %c0_i32_12 : i32 to vector<1x12xi32>
    %44 = arith.cmpi slt, %40, %43 : vector<1x12xi32>
    %c0_i32_13 = arith.constant 0 : i32
    %45 = arith.cmpi slt, %38, %c0_i32_13 : i32
    %46 = vector.broadcast %45 : i1 to vector<1x12xi1>
    %47 = vector.broadcast %46 : vector<1x12xi1> to vector<1x12xi1>
    %48 = arith.xori %44, %47 : vector<1x12xi1>
    %49 = arith.andi %48, %42 : vector<1x12xi1>
    %50 = vector.broadcast %38 : i32 to vector<1x12xi32>
    %51 = arith.addi %40, %50 : vector<1x12xi32>
    %52 = arith.select %49, %51, %40 : vector<1x12xi1>, vector<1x12xi32>
    %c3_i32_14 = arith.constant 3 : i32
    %53 = vector.broadcast %c3_i32_14 : i32 to vector<1x12xi32>
    %54 = arith.cmpi slt, %52, %53 : vector<1x12xi32>
    %cst_15 = arith.constant 0.00260416674 : f32
    %cst_16 = arith.constant 0.00260416674 : f32
    %55 = vector.broadcast %cst_15 : f32 to vector<1x12xf32>
    %56 = vector.broadcast %cst_16 : f32 to vector<1x12xf32>
    %57 = arith.select %54, %55, %56 : vector<1x12xi1>, vector<1x12xf32>
    %58 = vector.broadcast %57 : vector<1x12xf32> to vector<64x12xf32>
    %59 = arith.mulf %35, %58 : vector<64x12xf32>
    %60 = vector.shape_cast %59 : vector<64x12xf32> to vector<1x64x12xf32>
    %cst_17 = arith.constant dense<0.000000e+00> : vector<1xf32>
    %61 = vector.multi_reduction <add>, %60, %cst_17 [1, 2] : vector<1x64x12xf32> to vector<1xf32>
    %62 = vector.shape_cast %61 : vector<1xf32> to vector<1x1x1xf32>
    %63 = vector.extract %62[0, 0, 0] : f32 from vector<1x1x1xf32>
    %64 = arith.addf %31, %63 : f32
    %cst_18 = arith.constant 0.000000e+00 : f32
    %65 = arith.addf %64, %cst_18 : f32
    %c0_19 = arith.constant 0 : index
    %c0_20 = arith.constant 0 : index
    %66 = memref.load %arg2[%c0_19, %c0_20] : memref<1x1xf32, #tpu.memory_space<smem>>
    memref.store %65, %arg2[%c0_19, %c0_20] : memref<1x1xf32, #tpu.memory_space<smem>>
    return
  }
}

</mosaic_0001>

<bundles_post_ra>
// kernel: run.1
= control target key start
LH: loop header
LB: loop body
LE: loop exit
PB: predicated region body
PF: predicated region fallthrough
CT: control target
= control target key end

     0   :  { %s226_s25 = smov 6   ;;  %s363_s0 = inlined_call_operand.vmem [shape: f32[64,18], index: 0, kind: input, shape index: {}]   ;;  %s364_s1 = inlined_call_operand.vmem [shape: f32[64,18], index: 1, kind: input, shape index: {}]   ;;  %s365_s2 = inlined_call_operand.hbm [shape: f32[1,1], index: 2, kind: output, shape index: {}]  }
   0x1   :  { %v12_v0 = vld [vmem:[%s363_s0] sm:$0xff]  ;;  %v14_v2 = vld [vmem:[%s363_s0 + $0x10] sm:$0xff]  ;;  %v13_v5 = vld [vmem:[%s363_s0 + $0x8] sm:$0xff] }
   0x2   :  { %v20_v1 = vld [vmem:[%s364_s1] sm:$0xff]  ;;  %v22_v4 = vld [vmem:[%s364_s1 + $0x10] sm:$0xff]  ;;  %v21_v6 = vld [vmem:[%s364_s1 + $0x8] sm:$0xff] }
   0x3   :  { %v253_v3 = vsub.f32 %v12_v0, %v20_v1  ;;  %v264_v7 = vsub.f32 %v14_v2, %v22_v4  ;;  %v15_v8 = vld [vmem:[%s363_s0 + $0x18] sm:$0xff]  ;;  %v29_v10 = vsub.f32 %v13_v5, %v21_v6  ;;  %v16_v12 = vld [vmem:[%s363_s0 + $0x20] sm:$0xff]  ;;  %v17_v14 = vld [vmem:[%s363_s0 + $0x28] sm:$0xff] }
   0x4   :  { %v23_v9 = vld [vmem:[%s364_s1 + $0x18] sm:$0xff]  ;;  %v24_v13 = vld [vmem:[%s364_s1 + $0x20] sm:$0xff]  ;;  %v25_v15 = vld [vmem:[%s364_s1 + $0x28] sm:$0xff] }
   0x5   :  { %85 = vrot.lane.b32.xlu0 %v253_v3, %s226_s25  ;;  %89 = vrot.lane.b32.xlu1 %v264_v7, %s226_s25  ;;  %v274_v11 = vsub.f32 %v15_v8, %v23_v9  ;;  %v288_v16 = vsub.f32 %v16_v12, %v24_v13  ;;  %v291_v17 = vsub.f32 %v17_v14, %v25_v15  ;;  %v18_v18 = vld [vmem:[%s363_s0 + $0x30] sm:$0xff] }
   0x6   :  { %v26_v19 = vld [vmem:[%s364_s1 + $0x30] sm:$0xff] }
   0x9   :  { %87 = vrot.lane.b32.xlu0 %v29_v10, %s226_s25  ;;  %91 = vrot.lane.b32.xlu1 %v274_v11, %s226_s25 }
   0xa   :  { %7 = vsyncpa [#allocation3], 0  ;;  %v19_v20 = vld [vmem:[%s363_s0 + $0x38] sm:$0xff]  ;;  %v306_v22 = vsub.f32 %v18_v18, %v26_v19  ;;  %s227_s0 = smov 122   ;;  %v36_v42 = vand.u32 2147483647, %v253_v3 }
   0xb   :  { %v27_v21 = vld [vmem:[%s364_s1 + $0x38] sm:$0xff]  ;;  %v37_v44 = vand.u32 2147483647, %v29_v10  ;;  %v38_v53 = vand.u32 2147483647, %v264_v7  ;;  %vm52_vm0 = vcmask 146432  }
   0xc   :  { %v309_v23 = vsub.f32 %v19_v20, %v27_v21  ;;  %v44_v52 = vmul.f32 0.0017361111, %v36_v42  ;;  %v39_v60 = vand.u32 2147483647, %v274_v11  ;;  %v40_v4 = vand.u32 2147483647, %v288_v16 }
   0xd   :  { %93 = vrot.lane.b32.xlu0 %v288_v16, %s226_s25  ;;  %95 = vrot.lane.b32.xlu1 %v291_v17, %s226_s25  ;;  %v45_v55 = vmul.f32 0.0017361111, %v37_v44  ;;  %v46_v62 = vmul.f32 0.0017361111, %v38_v53  ;;  %vm165_vm1 = vcmask 97280   ;;  %s214_s18 = scalar_lea.hbm %s365_s2, 16 }
   0xe   :  { %v53_v61 = vsel %vm52_vm0, %v44_v52, 0.0  ;;  %v48_v6 = vmul.f32 0.0017361111, %v40_v4  ;;  %v43_v14 = vand.u32 2147483647, %v309_v23  ;;  %p215_p0 = scmp.ne.s32.totalorder %s365_s2, %s214_s18  ;;  %p218_p1 = scmp.lt.u32.totalorder %s214_s18, %s365_s2 }
   0xf   :  { %v54_v63 = vsel %vm52_vm0, %v45_v55, 0.0  ;;  %v56_v2 = vsel %vm52_vm0, %v46_v62, 0.0 }
  0x10   :  { %v55_v1 = vadd.f32 %v54_v63, %v53_v61  ;;  %v60_v12 = vsel %vm52_vm0, %v48_v6, 0.0  ;;  %v51_v19 = vmul.f32 0.0017361111, %v43_v14  ;;  %p220_p2 = pnand %p218_p1, %p215_p0 }
  0x11   :  { %97 = vrot.lane.b32.xlu0 %v306_v22, %s226_s25  ;;  %99 = vrot.lane.b32.xlu1 %v309_v23, %s226_s25 }
  0x12   :  { %v57_v5 = vadd.f32 %v56_v2, %v55_v1 }
  0x77   :  { %v86_v24 = vpop.permute.xlu0 %85  ;;  %v90_v26 = vpop.permute.xlu1 %89 }
  0x78   :  { %v109_v25 = vsub.f32 %v253_v3, %v86_v24  ;;  %v111_v27 = vsub.f32 %v264_v7, %v90_v26  ;;  %v47_v3 = vmul.f32 0.0017361111, %v39_v60  ;;  %v41_v7 = vand.u32 2147483647, %v291_v17 }
  0x7a   :  { %v117_v28 = vand.u32 2147483647, %v109_v25  ;;  %v119_v29 = vand.u32 2147483647, %v111_v27  ;;  %v58_v8 = vsel %vm52_vm0, %v47_v3, 0.0 }
  0x7b   :  { %v88_v30 = vpop.permute.xlu0 %87  ;;  %v92_v33 = vpop.permute.xlu1 %91  ;;  %v59_v9 = vadd.f32 %v58_v8, %v57_v5 }
  0x7c   :  { %v125_v31 = vmul.f32 0.0026041667, %v117_v28  ;;  %v110_v32 = vsub.f32 %v29_v10, %v88_v30  ;;  %v112_v34 = vsub.f32 %v274_v11, %v92_v33  ;;  %v127_v35 = vmul.f32 0.0026041667, %v119_v29 }
  0x7d   :  { %v42_v10 = vand.u32 2147483647, %v306_v22  ;;  %v49_v11 = vmul.f32 0.0017361111, %v41_v7  ;;  %v61_v13 = vadd.f32 %v60_v12, %v59_v9 }
  0x7e   :  { %v118_v36 = vand.u32 2147483647, %v110_v32  ;;  %141 = vrot.lane.b32.xlu0 %v125_v31, %s227_s0  ;;  %v120_v37 = vand.u32 2147483647, %v112_v34 }
  0x7f   :  { %v94_v38 = vpop.permute.xlu0 %93  ;;  %v96_v41 = vpop.permute.xlu1 %95  ;;  %v50_v15 = vmul.f32 0.0017361111, %v42_v10 }
  0x80   :  { %v126_v39 = vmul.f32 0.0026041667, %v118_v36  ;;  %v113_v40 = vsub.f32 %v288_v16, %v94_v38  ;;  %v114_v43 = vsub.f32 %v291_v17, %v96_v41  ;;  %v128_v45 = vmul.f32 0.0026041667, %v120_v37 }
  0x81   :  { %v62_v16 = vsel %vm52_vm0, %v49_v11, 0.0  ;;  %v64_v20 = vsel %vm52_vm0, %v50_v15, 0.0  ;;  %v66_v17 = vsel %vm52_vm0, %v51_v19, 0.0 }
  0x82   :  { %v121_v46 = vand.u32 2147483647, %v113_v40  ;;  %145 = vrot.lane.b32.xlu0 %v127_v35, %s227_s0  ;;  %143 = vrot.lane.b32.xlu1 %v126_v39, %s227_s0  ;;  %v122_v47 = vand.u32 2147483647, %v114_v43  ;;  %v63_v18 = vadd.f32 %v62_v16, %v61_v13 }
  0x83   :  { %v98_v48 = vpop.permute.xlu0 %97  ;;  %v100_v51 = vpop.permute.xlu1 %99 }
  0x84   :  { %v129_v49 = vmul.f32 0.0026041667, %v121_v46  ;;  %v115_v50 = vsub.f32 %v306_v22, %v98_v48  ;;  %v116_v54 = vsub.f32 %v309_v23, %v100_v51  ;;  %v130_v56 = vmul.f32 0.0026041667, %v122_v47 }
  0x85   :  { %v65_v21 = vadd.f32 %v64_v20, %v63_v18 }
  0x86   :  { %v123_v57 = vand.u32 2147483647, %v115_v50  ;;  %147 = vrot.lane.b32.xlu1 %v128_v45, %s227_s0  ;;  %149 = vrot.lane.b32.xlu0 %v129_v49, %s227_s0  ;;  %v124_v58 = vand.u32 2147483647, %v116_v54 }
  0x87   :  { %v67_v24 = vadd.f32 %v66_v17, %v65_v21 }
  0x88   :  { %v131_v59 = vmul.f32 0.0026041667, %v123_v57  ;;  %v132_v0 = vmul.f32 0.0026041667, %v124_v58 }
  0x8a   :  { %151 = vrot.lane.b32.xlu1 %v130_v56, %s227_s0  ;;  %153 = vrot.lane.b32.xlu0 %v131_v59, %s227_s0 }
  0x8e   :  { %155 = vrot.lane.b32.xlu1 %v132_v0, %s227_s0 }
  0xa9   :  { %68 = vadd.xlane.f32.xlu0 %v67_v24 }
  0xf0   :  { %v142_v25 = vpop.permute.xlu0 %141 }
  0xf1   :  { %v166_v27 = vsel %vm165_vm1, %v142_v25, 0.0 }
  0xf4   :  { %v144_v22 = vpop.permute.xlu1 %143  ;;  %v146_v26 = vpop.permute.xlu0 %145 }
  0xf5   :  { %v167_v23 = vsel %vm165_vm1, %v144_v22, 0.0  ;;  %v169_v29 = vsel %vm165_vm1, %v146_v26, 0.0 }
  0xf6   :  { %v168_v28 = vadd.f32 %v167_v23, %v166_v27 }
  0xf8   :  { %v170_v30 = vadd.f32 %v169_v29, %v168_v28  ;;  %v148_v31 = vpop.permute.xlu1 %147  ;;  %v150_v32 = vpop.permute.xlu0 %149 }
  0xf9   :  { %v171_v33 = vsel %vm165_vm1, %v148_v31, 0.0  ;;  %v173_v34 = vsel %vm165_vm1, %v150_v32, 0.0 }
  0xfa   :  { %v172_v35 = vadd.f32 %v171_v33, %v170_v30 }
  0xfc   :  { %v174_v36 = vadd.f32 %v173_v34, %v172_v35  ;;  %v152_v37 = vpop.permute.xlu1 %151  ;;  %v154_v38 = vpop.permute.xlu0 %153 }
  0xfd   :  { %v175_v39 = vsel %vm165_vm1, %v152_v37, 0.0  ;;  %v177_v40 = vsel %vm165_vm1, %v154_v38, 0.0 }
  0xfe   :  { %v176_v41 = vadd.f32 %v175_v39, %v174_v36 }
 0x100   :  { %v178_v42 = vadd.f32 %v177_v40, %v176_v41  ;;  %v156_v43 = vpop.permute.xlu1 %155 }
 0x101   :  { %v179_v44 = vsel %vm165_vm1, %v156_v43, 0.0 }
 0x102   :  { %v180_v45 = vadd.f32 %v179_v44, %v178_v42 }
 0x104   :  { %181 = vadd.xlane.f32.xlu1 %v180_v45 }
 0x136   :  { %v69_v46 = vpop.xlane.xlu0 %68 }
 0x137   :  { %v70_v47 = vrot.slane %v69_v46, 4 }
 0x139   :  { %v71_v48 = vadd.f32 %v70_v47, %v69_v46 }
 0x13b   :  { %v72_v49 = vrot.slane %v71_v48, 2 }
 0x13d   :  { %v73_v50 = vadd.f32 %v72_v49, %v71_v48 }
 0x13f   :  { %v74_v51 = vrot.slane %v73_v50, 1 }
 0x141   :  { %v75_v52 = vadd.f32 %v74_v51, %v73_v50 }
 0x143   :  { %207 = vpush %v75_v52 }
 0x174   :  { %s208_s1 = spop %207 }
 0x191   :  { %v182_v53 = vpop.xlane.xlu1 %181 }
 0x192   :  { %v183_v54 = vrot.slane %v182_v53, 4 }
 0x194   :  { %v184_v55 = vadd.f32 %v183_v54, %v182_v53 }
 0x196   :  { %v185_v56 = vrot.slane %v184_v55, 2 }
 0x198   :  { %v186_v57 = vadd.f32 %v185_v56, %v184_v55 }
 0x19a   :  { %v187_v58 = vrot.slane %v186_v57, 1 }
 0x19c   :  { %v188_v59 = vadd.f32 %v187_v58, %v186_v57 }
 0x19e   :  { %209 = vpush %v188_v59 }
 0x1cf   :  { %s210_s14 = spop %209 }
 0x1d0   :  { %s190_s15 = sadd.f32 %s210_s14, %s208_s1 }
 0x1d2   :  { %193 = sst [smem:[#allocation2]] %s190_s15 }
 0x1d3   :  { %223 = shalt.err (!%p220_p2)
}
 0x1d4   :  { %s228_s23 = smov [#allocation2]  }
 0x1d5   :  { %201 = dma.smem_to_hbm %s228_s23, 16, %s365_s2, [#allocation3]  }
 0x1d6   :  { %224 = dma.done.wait [#allocation3], 16  }
 0x1d7   :  { %225 = vsyncadd [#allocation3], 4294967280 }
 0x1d8   :  { %205 = sfence }
 0x1d9   :  { %206 = vsyncpa [#allocation3], 1 }

</bundles_post_ra>
